<compile_context>
chip_gen: v7x
topology: tpu7x:2x2x1
jax: 0.10.0
libtpu: 0.0.40
codegen_flags: <defaults>
</compile_context>

<pallas_src>
import math

import jax
import jax.numpy as jnp
from jax import lax
from jax.experimental import pallas as pl
from jax.experimental.pallas import tpu as pltpu

_INV_SQRT2 = 0.7071067811865476  # 1/sqrt(2), exact (erf) GELU like nn.GELU()


def _round_up(x: int, m: int) -> int:
    return ((x + m - 1) // m) * m


def _embed_fc_kernel(x_ref, w1_ref, b1_ref, w2_ref, b2_ref, out_ref):
    # x_ref : (TB, input_dim)       bf16
    # w1_ref: (input_dim, emb_pad)  bf16    b1_ref: (1, emb_pad) f32
    # w2_ref: (emb_pad, emb_pad)    bf16    b2_ref: (1, emb_pad) f32
    # out_ref: (TB, emb_pad)
    x = x_ref[...]

    # Linear 1: bf16 operands, single-pass MXU, f32 accumulation.
    h = jnp.dot(x, w1_ref[...], preferred_element_type=jnp.float32) + b1_ref[...]

    # Exact (erf) GELU in f32 (matches PyTorch nn.GELU() default).
    h = 0.5 * h * (1.0 + lax.erf(h * _INV_SQRT2))

    # Linear 2: cast hidden to bf16 for a single-pass MXU matmul, f32 acc.
    o = jnp.dot(h.astype(w2_ref.dtype), w2_ref[...],
                preferred_element_type=jnp.float32) + b2_ref[...]
    out_ref[...] = o.astype(out_ref.dtype)


def _pick_row_tile(b: int) -> int:
    """Row tile: multiple of 8, targets ~8 grid steps (keeps both v7x TCs busy
    and overlaps row DMAs), but >=128 rows per step for MXU fill, <=512 rows
    for VMEM, and never larger than the (8-aligned) batch."""
    b8 = _round_up(max(b, 1), 8)
    tb = _round_up(pl.cdiv(b8, 8), 8)
    tb = max(128, min(512, tb))
    return min(tb, b8)


def _vmem_estimate(tb, input_dim, emb_pad, w_bytes, out_bytes):
    return (
        2 * tb * input_dim * w_bytes     # x tile (double-buffered)
        + input_dim * emb_pad * w_bytes  # W1 (resident, single buffer)
        + emb_pad * emb_pad * w_bytes    # W2 (resident, single buffer)
        + 2 * emb_pad * 4                # biases (f32)
        + 2 * tb * emb_pad * out_bytes   # out tile (double-buffered)
        + tb * emb_pad * 4               # f32 hidden activation
    )


def embed_fc(x, w1, b1, w2, b2, *, compute_dtype=jnp.bfloat16,
             out_dtype=jnp.float32):
    """Pallas TPU equivalent of EmbedFC(input_dim, emb_dim).forward(x).

    x : any shape whose elements flatten to (-1, input_dim)
    w1: (input_dim, emb_dim)   b1: (emb_dim,)
    w2: (emb_dim, emb_dim)     b2: (emb_dim,)
    returns: (B, emb_dim) in out_dtype, B = x.size // input_dim
    """
    input_dim, emb_dim = w1.shape
    assert w2.shape == (emb_dim, emb_dim)

    # x.view(-1, input_dim), cast to the MXU compute dtype (bf16).
    x2d = x.reshape(-1, input_dim).astype(compute_dtype)
    B = x2d.shape[0]

    # Lane-dense hidden / output width: pad emb_dim to a multiple of 128.
    # Zero-padded W1 cols / b1 entries => padded hidden cols are exactly 0
    # (GELU(0)=0); zero-padded W2 rows/cols / b2 => padded output cols are 0.
    emb_pad = _round_up(emb_dim, 128)
    w1c = w1.astype(compute_dtype)
    w2c = w2.astype(compute_dtype)
    b1f = b1.astype(jnp.float32)
    b2f = b2.astype(jnp.float32)
    if emb_pad != emb_dim:
        pe = emb_pad - emb_dim
        w1c = jnp.pad(w1c, ((0, 0), (0, pe)))
        w2c = jnp.pad(w2c, ((0, pe), (0, pe)))
        b1f = jnp.pad(b1f, (0, pe))
        b2f = jnp.pad(b2f, (0, pe))
    b1_2d = b1f.reshape(1, emb_pad)
    b2_2d = b2f.reshape(1, emb_pad)

    # Per-generation VMEM budget (128 MiB v5e/v6e, 64 MiB per-TC v7x).
    try:
        info = pltpu.get_tpu_info()
        vmem_cap = int(getattr(info, "vmem_capacity_bytes", 64 * 1024 * 1024))
    except Exception:
        vmem_cap = 64 * 1024 * 1024   # conservative (v7x per-TC)
    budget = int(vmem_cap * 0.75)     # headroom for Mosaic internal scratch

    w_bytes = jnp.dtype(compute_dtype).itemsize
    out_bytes = jnp.dtype(out_dtype).itemsize

    tb = _pick_row_tile(B)
    while tb > 8 and _vmem_estimate(tb, input_dim, emb_pad, w_bytes,
                                    out_bytes) > budget:
        tb = max(8, _round_up(tb // 2, 8))
    # TODO(synk): N-tile the second matmul (grid axis over emb_pad columns) if
    # the bf16 weights alone exceed the VMEM budget (emb_dim >~ 4-5k); not
    # needed for typical EmbedFC sizes.

    est = _vmem_estimate(tb, input_dim, emb_pad, w_bytes, out_bytes)
    vmem_limit = int(min(budget, max(32 * 1024 * 1024,
                                     int(1.5 * est) + (2 << 20))))

    grid = (pl.cdiv(B, tb),)   # ragged last block handled by Pallas (rows indep.)

    cost = pl.CostEstimate(
        flops=2 * B * input_dim * emb_pad + 2 * B * emb_pad * emb_pad
        + 3 * B * emb_pad,
        transcendentals=B * emb_pad,   # advisory only (erf lowers to VALU poly)
        bytes_accessed=(
            w_bytes * (B * input_dim + input_dim * emb_pad + emb_pad * emb_pad)
            + out_bytes * B * emb_pad
            + 4 * 2 * emb_pad
        ),
    )

    out = pl.pallas_call(
        _embed_fc_kernel,
        out_shape=jax.ShapeDtypeStruct((B, emb_pad), out_dtype),
        grid=grid,
        in_specs=[
            # x rows: pipelined / double-buffered across the row grid.
            pl.BlockSpec((tb, input_dim), lambda i: (i, 0)),
            # Weights / biases: constant index_map, single-buffered residents.
            pl.BlockSpec((input_dim, emb_pad), lambda i: (0, 0),
                         pipeline_mode=pl.Buffered(1)),
            pl.BlockSpec((1, emb_pad), lambda i: (0, 0),
                         pipeline_mode=pl.Buffered(1)),
            pl.BlockSpec((emb_pad, emb_pad), lambda i: (0, 0),
                         pipeline_mode=pl.Buffered(1)),
            pl.BlockSpec((1, emb_pad), lambda i: (0, 0),
                         pipeline_mode=pl.Buffered(1)),
        ],
        out_specs=pl.BlockSpec((tb, emb_pad), lambda i: (i, 0)),
        compiler_params=pltpu.CompilerParams(
            dimension_semantics=("parallel",),   # rows independent; v7x 2 TCs
            vmem_limit_bytes=vmem_limit,
        ),
        cost_estimate=cost,
    )(x2d, w1c, b1_2d, w2c, b2_2d)

    if emb_pad != emb_dim:
        out = out[:, :emb_dim]
    return out


def _reference(x, w1, b1, w2, b2):
    """Pure-JAX f32 reference of EmbedFC forward (exact GELU)."""
    input_dim = w1.shape[0]
    x2d = x.reshape(-1, input_dim).astype(jnp.float32)
    h = jnp.dot(x2d, w1, precision=lax.Precision.HIGHEST) + b1
    h = 0.5 * h * (1.0 + lax.erf(h * _INV_SQRT2))
    return jnp.dot(h, w2, precision=lax.Precision.HIGHEST) + b2


if __name__ == "__main__":
    key = jax.random.PRNGKey(0)
    k1, k2, k3, k4, k5 = jax.random.split(key, 5)

    input_dim, emb_dim = 16, 32
    # Arbitrary leading shape; forward flattens it to (-1, input_dim) => B=8.
    x = jax.random.normal(k1, (2, 4, input_dim), dtype=jnp.float32)

    # nn.Linear-style uniform(-1/sqrt(fan_in), 1/sqrt(fan_in)) init, deterministic.
    s1 = 1.0 / math.sqrt(input_dim)
    s2 = 1.0 / math.sqrt(emb_dim)
    w1 = jax.random.uniform(k2, (input_dim, emb_dim), jnp.float32, -s1, s1)
    b1 = jax.random.uniform(k3, (emb_dim,), jnp.float32, -s1, s1)
    w2 = jax.random.uniform(k4, (emb_dim, emb_dim), jnp.float32, -s2, s2)
    b2 = jax.random.uniform(k5, (emb_dim,), jnp.float32, -s2, s2)

    out = embed_fc(x, w1, b1, w2, b2)
    out = jax.block_until_ready(out)

    ref = _reference(x, w1, b1, w2, b2)
    assert out.shape == (8, emb_dim), out.shape
    # bf16 operands with f32 accumulation vs f32 reference: loosened tolerance.
    assert jnp.allclose(out.astype(jnp.float32), ref, atol=3e-2, rtol=3e-2), \
        "mismatch vs reference"

    print("KERNEL_OK")
</pallas_src>

<mosaic_0001>
module attributes {stable_mosaic.version = 11 : i64} {
  func.func @_embed_fc_kernel(%arg0: i32, %arg1: memref<8x16xbf16, #tpu.memory_space<vmem>>, %arg2: memref<16x128xbf16, #tpu.memory_space<vmem>>, %arg3: memref<1x128xf32, #tpu.memory_space<vmem>>, %arg4: memref<128x128xbf16, #tpu.memory_space<vmem>>, %arg5: memref<1x128xf32, #tpu.memory_space<vmem>>, %arg6: memref<8x128xf32, #tpu.memory_space<vmem>>) attributes {dimension_semantics = [#tpu.dimension_semantics<parallel>], iteration_bounds = array<i64: 1>, scalar_prefetch = 0 : i64, scratch_operands = 0 : i64, tpu.core_type = #tpu.core_type<tc>, window_params = [{transform_indices = @transform_0, window_bounds = array<i64: 8, 16>}, {pipeline_mode = #tpu.pipeline_mode<synchronous>, transform_indices = @transform_1, window_bounds = array<i64: 16, 128>}, {pipeline_mode = #tpu.pipeline_mode<synchronous>, transform_indices = @transform_2, window_bounds = array<i64: 1, 128>}, {pipeline_mode = #tpu.pipeline_mode<synchronous>, transform_indices = @transform_3, window_bounds = array<i64: 128, 128>}, {pipeline_mode = #tpu.pipeline_mode<synchronous>, transform_indices = @transform_4, window_bounds = array<i64: 1, 128>}, {transform_indices = @transform_5, window_bounds = array<i64: 8, 128>}]} {
    %c0 = arith.constant 0 : index
    %c0_0 = arith.constant 0 : index
    %0 = vector.load %arg1[%c0, %c0_0] : memref<8x16xbf16, #tpu.memory_space<vmem>>, vector<8x16xbf16>
    %c0_1 = arith.constant 0 : index
    %c0_2 = arith.constant 0 : index
    %1 = vector.load %arg2[%c0_1, %c0_2] : memref<16x128xbf16, #tpu.memory_space<vmem>>, vector<16x128xbf16>
    %cst = arith.constant dense<0.000000e+00> : vector<8x128xf32>
    %2 = tpu.matmul %0, %1, %cst {dimension_numbers = #tpu.dot_dimension_numbers<[1], [0], [0], [1], [0, 0, 1, 1], [], []>} : vector<8x16xbf16>, vector<16x128xbf16>, vector<8x128xf32> -> vector<8x128xf32>
    %c0_3 = arith.constant 0 : index
    %c0_4 = arith.constant 0 : index
    %3 = vector.load %arg3[%c0_3, %c0_4] : memref<1x128xf32, #tpu.memory_space<vmem>>, vector<1x128xf32>
    %4 = vector.broadcast %3 : vector<1x128xf32> to vector<8x128xf32>
    %5 = arith.addf %2, %4 : vector<8x128xf32>
    %cst_5 = arith.constant 5.000000e-01 : f32
    %6 = vector.broadcast %cst_5 : f32 to vector<8x128xf32>
    %7 = arith.mulf %6, %5 : vector<8x128xf32>
    %cst_6 = arith.constant 0.707106769 : f32
    %8 = vector.broadcast %cst_6 : f32 to vector<8x128xf32>
    %9 = arith.mulf %5, %8 : vector<8x128xf32>
    %10 = math.erf %9 : vector<8x128xf32>
    %cst_7 = arith.constant 1.000000e+00 : f32
    %11 = vector.broadcast %cst_7 : f32 to vector<8x128xf32>
    %12 = arith.addf %11, %10 : vector<8x128xf32>
    %13 = arith.mulf %7, %12 : vector<8x128xf32>
    %14 = arith.truncf %13 : vector<8x128xf32> to vector<8x128xbf16>
    %c0_8 = arith.constant 0 : index
    %c0_9 = arith.constant 0 : index
    %15 = vector.load %arg4[%c0_8, %c0_9] : memref<128x128xbf16, #tpu.memory_space<vmem>>, vector<128x128xbf16>
    %cst_10 = arith.constant dense<0.000000e+00> : vector<8x128xf32>
    %16 = tpu.matmul %14, %15, %cst_10 {dimension_numbers = #tpu.dot_dimension_numbers<[1], [0], [0], [1], [0, 0, 1, 1], [], []>} : vector<8x128xbf16>, vector<128x128xbf16>, vector<8x128xf32> -> vector<8x128xf32>
    %c0_11 = arith.constant 0 : index
    %c0_12 = arith.constant 0 : index
    %17 = vector.load %arg5[%c0_11, %c0_12] : memref<1x128xf32, #tpu.memory_space<vmem>>, vector<1x128xf32>
    %18 = vector.broadcast %17 : vector<1x128xf32> to vector<8x128xf32>
    %19 = arith.addf %16, %18 : vector<8x128xf32>
    %c0_13 = arith.constant 0 : index
    %c0_14 = arith.constant 0 : index
    %20 = vector.load %arg6[%c0_13, %c0_14] : memref<8x128xf32, #tpu.memory_space<vmem>>, vector<8x128xf32>
    tpu.vector_store %arg6[%c0_13, %c0_14], %19 {strides = array<i32>} : memref<8x128xf32, #tpu.memory_space<vmem>>, vector<8x128xf32>,
    return
  }
  func.func @transform_0(%arg0: i32) -> (i32, i32) {
    %c0_i32 = arith.constant 0 : i32
    %c0_i32_0 = arith.constant 0 : i32
    return %arg0, %c0_i32 : i32, i32
  }
  func.func @transform_1(%arg0: i32) -> (i32, i32) {
    %c0_i32 = arith.constant 0 : i32
    %c0_i32_0 = arith.constant 0 : i32
    %c0_i32_1 = arith.constant 0 : i32
    return %c0_i32, %c0_i32_0 : i32, i32
  }
  func.func @transform_2(%arg0: i32) -> (i32, i32) {
    %c0_i32 = arith.constant 0 : i32
    %c0_i32_0 = arith.constant 0 : i32
    %c0_i32_1 = arith.constant 0 : i32
    return %c0_i32, %c0_i32_0 : i32, i32
  }
  func.func @transform_3(%arg0: i32) -> (i32, i32) {
    %c0_i32 = arith.constant 0 : i32
    %c0_i32_0 = arith.constant 0 : i32
    %c0_i32_1 = arith.constant 0 : i32
    return %c0_i32, %c0_i32_0 : i32, i32
  }
  func.func @transform_4(%arg0: i32) -> (i32, i32) {
    %c0_i32 = arith.constant 0 : i32
    %c0_i32_0 = arith.constant 0 : i32
    %c0_i32_1 = arith.constant 0 : i32
    return %c0_i32, %c0_i32_0 : i32, i32
  }
  func.func @transform_5(%arg0: i32) -> (i32, i32) {
    %c0_i32 = arith.constant 0 : i32
    %c0_i32_0 = arith.constant 0 : i32
    return %arg0, %c0_i32 : i32, i32
  }
}

</mosaic_0001>

<bundles_post_ra>
// kernel: tpu_custom_call.1
= control target key start
LH: loop header
LB: loop body
LE: loop exit
PB: predicated region body
PF: predicated region fallthrough
CT: control target
= control target key end

     0   :  { %10 = vsyncpa [#allocation3], 0  ;;  %s515_s0 = inlined_call_operand.hbm [shape: bf16[8,16], index: 0, kind: input, shape index: {}]   ;;  %s516_s1 = inlined_call_operand.hbm [shape: bf16[16,128], index: 1, kind: input, shape index: {}]   ;;  %s517_s2 = inlined_call_operand.vmem [shape: f32[1,128], index: 2, kind: input, shape index: {}]   ;;  %s518_s3 = inlined_call_operand.hbm [shape: bf16[128,128], index: 3, kind: input, shape index: {}]   ;;  %s519_s4 = inlined_call_operand.vmem [shape: f32[1,128], index: 4, kind: input, shape index: {}]   ;;  %s520_s5 = inlined_call_operand.hbm [shape: f32[8,128], index: 5, kind: output, shape index: {}]  }
   0x1   :  { %11 = vsyncpa [#allocation6], 0 }
   0x2   :  { %12 = vsyncpa [#allocation4], 0  ;;  %s417_s18 = smov [#allocation5]   ;;  %s323_s22 = scalar_lea.hbm %s516_s1, 128 }
   0x3   :  { %s28_s19 = sshll.u32 %s417_s18, 4  ;;  %p324_p0 = scmp.ne.s32.totalorder %s516_s1, %s323_s22  ;;  %s29_s19 = int_to_ptr.vmem [resolvable:$true] %s28_s19 }
   0x4   :  { %p327_p1 = scmp.lt.u32.totalorder %s323_s22, %s516_s1 }
   0x6   :  { %p329_p2 = pnand %p327_p1, %p324_p0 }
   0x8   :  { %332 = shalt.err (!%p329_p2)
}
   0x9   :  { %s333_s27 = scalar_lea.vmem %s29_s19, 128  ;;  %p338_p4 = scmp.lt.s32.totalorder %s29_s19, %s29_s19 }
   0xa   :  { %p334_p3 = scmp.ne.s32.totalorder %s29_s19, %s333_s27  ;;  %p339_p5 = scmp.lt.s32.totalorder %s333_s27, %s333_s27 }
   0xc   :  { %p340_p6 = por %p339_p5, %p338_p4 }
   0xe   :  { %p341_p7 = pnand %p340_p6, %p334_p3 }
  0x10   :  { %344 = shalt.err (!%p341_p7)
}
  0x11   :  { %s418_s28 = smov 64   ;;  %s419_s29 = smov 4  }
  0x12   :  { %34 = dma.hbm_to_vmem [thread:$0]  %s516_s1, 128, %s29_s19, [#allocation6], %s418_s28, %s418_s28, %s419_s29  }
  0x13   :  { %s420_s7 = smov [#allocation2]   ;;  %s421_s9 = smov [#allocation7]  }
  0x14   :  { %s19_s8 = sshll.u32 %s420_s7, 4  ;;  %s42_s10 = sshll.u32 %s421_s9, 4  ;;  %s20_s8 = int_to_ptr.vmem [resolvable:$true] %s19_s8  ;;  %s43_s10 = int_to_ptr.vmem [resolvable:$true] %s42_s10 }
  0x15   :  { %s345_s13 = scalar_lea.hbm %s515_s0, 64 }
  0x16   :  { %p346_p8 = scmp.ne.s32.totalorder %s515_s0, %s345_s13  ;;  %p349_p9 = scmp.lt.u32.totalorder %s345_s13, %s515_s0 }
  0x18   :  { %p351_p10 = pnand %p349_p9, %p346_p8 }
  0x1a   :  { %354 = shalt.err (!%p351_p10)
}
  0x1b   :  { %s355_s1 = scalar_lea.vmem %s20_s8, 64  ;;  %p360_p12 = scmp.lt.s32.totalorder %s20_s8, %s20_s8 }
  0x1c   :  { %p356_p11 = scmp.ne.s32.totalorder %s20_s8, %s355_s1  ;;  %p361_p13 = scmp.lt.s32.totalorder %s355_s1, %s355_s1 }
  0x1e   :  { %p362_p0 = por %p361_p13, %p360_p12 }
  0x20   :  { %p363_p1 = pnand %p362_p0, %p356_p11 }
  0x22   :  { %366 = shalt.err (!%p363_p1)
}
  0x23   :  { %22 = dma.hbm_to_vmem [thread:$0]  %s515_s0, 64, %s20_s8, [#allocation3]  }
  0x24   :  { %s367_s22 = scalar_lea.hbm %s518_s3, 1024 }
  0x25   :  { %p368_p2 = scmp.ne.s32.totalorder %s518_s3, %s367_s22  ;;  %p371_p3 = scmp.lt.u32.totalorder %s367_s22, %s518_s3 }
  0x27   :  { %p373_p4 = pnand %p371_p3, %p368_p2 }
  0x29   :  { %376 = shalt.err (!%p373_p4)
}
  0x2a   :  { %s377_s27 = scalar_lea.vmem %s43_s10, 1024  ;;  %p382_p6 = scmp.lt.s32.totalorder %s43_s10, %s43_s10 }
  0x2b   :  { %p378_p5 = scmp.ne.s32.totalorder %s43_s10, %s377_s27  ;;  %p383_p7 = scmp.lt.s32.totalorder %s377_s27, %s377_s27 }
  0x2d   :  { %p384_p8 = por %p383_p7, %p382_p6 }
  0x2f   :  { %p385_p9 = pnand %p384_p8, %p378_p5 }
  0x31   :  { %388 = shalt.err (!%p385_p9)
}
  0x32   :  { %48 = dma.hbm_to_vmem [thread:$0]  %s518_s3, 1024, %s43_s10, [#allocation6], %s418_s28, %s418_s28, %s419_s29  }
  0x33   :  { %411 = dma.done.wait [#allocation3], 64  }
  0x34   :  { %412 = vsyncadd [#allocation3], 4294967232 }
  0x35   :  { %413 = dma.done.wait [#allocation6], 1152  }
  0x36   :  { %414 = vsyncadd [#allocation6], 4294966144  ;;  %v422_v0 = vmov 0.0   ;;  %vm423_vm0 = vmmov 0   ;;  %v312_v1 = vld [vmem:[#allocation5] sm:$0xff]   ;;  %vm77_vm1 = vcmask 130048  }
  0x37   :  { %278 = vmatprep.subr.bf16.mxu0 %v422_v0  ;;  %280 = vmatprep.mubr.msk.bf16.mxu0 %vm423_vm0, %v422_v0  ;;  %v61_v2 = vld [vmem:[#allocation2] sm:$0xf]  ;;  %v313_v3 = vld [vmem:[#allocation7] sm:$0xff]   ;;  %v314_v4 = vld [vmem:[#allocation7 + $0x8] sm:$0xff]   ;;  %s424_s7 = smov [#allocation8]  }
  0x38   :  { %284 = vmatprep.subr.bf16.mxu1 %v422_v0  ;;  %300 = vmatprep.mubr.msk.bf16.mxu1 %vm423_vm0, %v422_v0  ;;  %v315_v5 = vld [vmem:[#allocation7 + $0x10] sm:$0xff]   ;;  %v316_v6 = vld [vmem:[#allocation7 + $0x18] sm:$0xff]   ;;  %v317_v7 = vld [vmem:[#allocation7 + $0x20] sm:$0xff]   ;;  %s245_s8 = sshll.u32 %s424_s7, 4  ;;  %s246_s8 = int_to_ptr.vmem [resolvable:$true] %s245_s8 }
  0x39   :  { %279 = vmatpush3.bf16.msra.mxu0 %v312_v1  ;;  %285 = vmatpush3.bf16.msra.mxu1 %v313_v3  ;;  %v318_v8 = vld [vmem:[#allocation7 + $0x28] sm:$0xff]   ;;  %v319_v9 = vld [vmem:[#allocation7 + $0x30] sm:$0xff]   ;;  %v320_v10 = vld [vmem:[#allocation7 + $0x38] sm:$0xff]   ;;  %p394_p11 = scmp.lt.s32.totalorder %s246_s8, %s246_s8 }
  0x3a   :  { %286 = vmatprep.subr.bf16.mxu1 %v422_v0  ;;  %v255_v11 = vld [vmem:[%s517_s2] ss:$0 sm:$0xff]  ;;  %s389_s2 = scalar_lea.vmem %s246_s8, 128 }
  0x3b   :  { %v258_v23 = vld [vmem:[%s519_s4] ss:$0 sm:$0xff]  ;;  %p390_p10 = scmp.ne.s32.totalorder %s246_s8, %s389_s2  ;;  %p395_p12 = scmp.lt.s32.totalorder %s389_s2, %s389_s2 }
  0x3c   :  { %281 = vmatmul.mubr.msk.bf16.vlgmr.msra.gmra.mrb[0].mxu0 %vm77_vm1, %v61_v2 }
  0x3d   :  { %287 = vmatpush3.bf16.msra.mxu1 %v314_v4  ;;  %p396_p13 = por %p395_p12, %p394_p11 }
  0x3e   :  { %288 = vmatprep.subr.bf16.mxu1 %v422_v0 }
  0x3f   :  { %p397_p0 = pnand %p396_p13, %p390_p10 }
  0x41   :  { %289 = vmatpush3.bf16.msra.mxu1 %v315_v5 }
  0x42   :  { %290 = vmatprep.subr.bf16.mxu1 %v422_v0 }
  0x45   :  { %291 = vmatpush3.bf16.msra.mxu1 %v316_v6 }
  0x46   :  { %292 = vmatprep.subr.bf16.mxu1 %v422_v0 }
  0x49   :  { %293 = vmatpush3.bf16.msra.mxu1 %v317_v7 }
  0x4a   :  { %294 = vmatprep.subr.bf16.mxu1 %v422_v0 }
  0x4d   :  { %295 = vmatpush3.bf16.msra.mxu1 %v318_v8 }
  0x4e   :  { %296 = vmatprep.subr.bf16.mxu1 %v422_v0 }
  0x51   :  { %297 = vmatpush3.bf16.msra.mxu1 %v319_v9 }
  0x52   :  { %298 = vmatprep.subr.bf16.mxu1 %v422_v0 }
  0x55   :  { %299 = vmatpush3.bf16.msra.mxu1 %v320_v10 }
 0x10f   :  { %v115_v12 = vpop.f32.mrb[0].mxu0 }
 0x110   :  { %v116_v13 = vadd.f32 %v255_v11, %v115_v12  ;;  %v282_v14 = vpop.f32.mrb[1].mxu0 }
 0x111   :  { %v118_v15 = vpop.f32.mrb[2].mxu0 }
 0x112   :  { %v122_v16 = vmul.f32 0.70710677, %v116_v13  ;;  %v283_v17 = vpop.f32.mrb[3].mxu0  ;;  %v121_v19 = vmul.f32 0.5, %v116_v13 }
 0x114   :  { %321 = verf.f32 %v122_v16 }
 0x11e   :  { %v322_v18 = vpop.eup %321 }
 0x11f   :  { %v124_v20 = vadd.f32 1.0, %v322_v18 }
 0x121   :  { %v125_v21 = vmul.f32 %v124_v20, %v121_v19 }
 0x123   :  { %v126_v22 = vpack.c.bf16 %v125_v21, %v125_v21 }
 0x125   :  { %301 = vmatmul.mubr.bf16.vlgmr.msra.gmra.mrb[0].mxu1 %v126_v22 }
 0x1f8   :  { %v232_v24 = vpop.f32.mrb[0].mxu1 }
 0x1f9   :  { %v233_v25 = vadd.f32 %v258_v23, %v232_v24  ;;  %v302_v26 = vpop.f32.mrb[1].mxu1 }
 0x1fa   :  { %v235_v27 = vpop.f32.mrb[2].mxu1 }
 0x1fb   :  { %238 = vst [vmem:[#allocation8] sm:$0xff] %v233_v25  ;;  %v303_v28 = vpop.f32.mrb[3].mxu1 }
 0x1fc   :  { %400 = shalt.err (!%p397_p0)
}
 0x1fd   :  { %s401_s4 = scalar_lea.hbm %s520_s5, 128 }
 0x1fe   :  { %p402_p1 = scmp.ne.s32.totalorder %s520_s5, %s401_s4  ;;  %p405_p2 = scmp.lt.u32.totalorder %s401_s4, %s520_s5 }
 0x200   :  { %p407_p3 = pnand %p405_p2, %p402_p1 }
 0x202   :  { %410 = shalt.err (!%p407_p3)
}
 0x203   :  { %248 = dma.vmem_to_hbm [thread:$0]  %s246_s8, 128, %s520_s5, [#allocation4]  }
 0x204   :  { %415 = dma.done.wait [#allocation4], 128  }
 0x205   :  { %416 = vsyncadd [#allocation4], 4294967168 }
 0x206   :  { %252 = vsyncpa [#allocation3], 1 }
 0x207   :  { %253 = vsyncpa [#allocation6], 1 }
 0x208   :  { %254 = vsyncpa [#allocation4], 1 }

</bundles_post_ra>
